<compile_context>
chip_gen: v6e
topology: v6e:2x2x1
jax: 0.10.0
libtpu: 0.0.40
codegen_flags: <defaults>
</compile_context>

<pallas_src>
import math
from functools import partial

import jax
import jax.numpy as jnp
from jax.experimental import pallas as pl
from jax.experimental.pallas import tpu as pltpu

STRIDE = 4
PADDING = 38
KSIZE = 80
COUT = 64

# bf16 MXU operands only when a real TPU backend executes the kernel; the CPU
# interpreter (used by the sandbox) only supports f32 x f32 = f32 dots.
_MXU_DTYPE = jnp.bfloat16 if jax.default_backend() == "tpu" else jnp.float32


def _frontend_kernel(xm_ref, xh_ref, wt_ref, shift_ref, alpha_ref, o_ref):
    """One (time-tile, batch) grid step.

    xm_ref:    (1, 8, U)    8-phase frames of this tile (frame f holds xp[8f:8f+8])
    xh_ref:    (1, 8, 128)  halo: the next 128 frames
    wt_ref:    (128, 128)   taps x eo-channels; cols 0..63 even-parity ch, 64..127 odd
    shift_ref: (1, 128) f32 folded BN shift, duplicated across both parities
    alpha_ref: (1, 128) f32 PReLU slopes, duplicated across both parities
    o_ref:     (1, U, 128)  row u = [out(t=2u, c=0..63) | out(t=2u+1, c=0..63)]
    """
    u = xm_ref.shape[2]
    # contiguous frame window for this tile: chunk[q, i] = xp[8*(frame_base + i) + q]
    chunk = jnp.concatenate([xm_ref[0], xh_ref[0]], axis=1)                 # (8, U+128)
    # patch^T: row 8m+q, col i == xp[8*(frame_base + i) + 8m + q]
    # built from 16 sublane-aligned (8, U) lane-shifted slices (static offsets).
    patT = jnp.concatenate([chunk[:, m:m + u] for m in range(16)], axis=0)  # (128, U)
    # transpose in the narrow compute dtype (bf16 on TPU) -> MXU emits (U, 128) directly,
    # no f32 transpose anywhere in the kernel.
    pat = patT.T                                                            # (U, 128)
    acc = jnp.dot(pat, wt_ref[...], preferred_element_type=jnp.float32)     # (U, 128) f32
    y = acc + shift_ref[...]                                                # BN shift
    y = jnp.where(y >= 0.0, y, alpha_ref[...] * y)                          # PReLU
    o_ref[0] = y.astype(o_ref.dtype)                                        # bf16 store


def _round_up(x, m):
    return (x + m - 1) // m * m


@partial(jax.jit, static_argnames=("eps", "max_half_tile", "out_dtype"))
def _frontend_padded(x, w, gamma, beta, running_mean, running_var, alpha,
                     *, eps=1e-5, max_half_tile=4096, out_dtype=jnp.bfloat16):
    """x: (B, 1, L) f32, w: (64, 1, 80) (PyTorch Conv1d layout).
    Returns (B, 2*n_tiles*U, 64) activation, time-padded up to the tile size."""
    B, cin, L = x.shape
    cout, _, K = w.shape
    assert cin == 1 and cout == COUT and K == KSIZE

    T_out = (L + 2 * PADDING - K) // STRIDE + 1
    # Each kernel step produces 2*U output frames (even/odd stride-parity pairs).
    max_half_tile = max(128, (max_half_tile // 128) * 128)
    U = min(max_half_tile, _round_up(pl.cdiv(T_out, 2), 128))
    n_tiles = pl.cdiv(T_out, 2 * U)
    F8 = n_tiles * U + 128                       # number of 8-sample frames provided

    # ---- fold BN scale into the conv weights, stack the two output parities ----
    scale = gamma / jnp.sqrt(running_var + eps)                    # (64,)
    shift = beta - running_mean * scale                            # (64,)
    ws = w[:, 0, :] * scale[:, None]                               # (64, 80)
    w_even = jnp.pad(ws, ((0, 0), (0, 128 - K)))                   # taps at column k
    w_odd = jnp.pad(ws, ((0, 0), (STRIDE, 128 - K - STRIDE)))      # taps at column k+4
    # (128 taps, 128 eo-channels): column c<64 even-parity ch c, column 64+c odd-parity ch c
    wt_eo = jnp.concatenate([w_even, w_odd], axis=0).T.astype(_MXU_DTYPE)
    shift2 = jnp.concatenate([shift, shift]).reshape(1, 2 * cout)
    alpha2 = jnp.concatenate([alpha, alpha]).reshape(1, 2 * cout)

    # ---- 8-phase framing of the padded signal (no host-side im2col blow-up) ----
    xp = jnp.pad(x[:, 0, :], ((0, 0), (PADDING, 8 * F8 - L - PADDING)))    # (B, 8*F8)
    xg = jnp.transpose(xp.reshape(B, F8, 8), (0, 2, 1)).astype(_MXU_DTYPE)  # (B, 8, F8)

    u_blocks = U // 128
    flops = 2 * B * n_tiles * U * 128 * 128
    bytes_accessed = (xg.size * xg.dtype.itemsize
                      + B * n_tiles * U * 128 * jnp.dtype(out_dtype).itemsize
                      + wt_eo.size * wt_eo.dtype.itemsize)

    out2 = pl.pallas_call(
        _frontend_kernel,
        out_shape=jax.ShapeDtypeStruct((B, n_tiles * U, 128), out_dtype),
        grid_spec=pltpu.PrefetchScalarGridSpec(
            num_scalar_prefetch=0,
            grid=(n_tiles, B),        # long time axis outermost -> megacore shards it
            in_specs=[
                pl.BlockSpec((1, 8, U), lambda j, b: (b, 0, j)),
                pl.BlockSpec((1, 8, 128),
                             lambda j, b: (b, 0, j * u_blocks + u_blocks)),
                pl.BlockSpec((2 * cout, 2 * cout), lambda j, b: (0, 0)),
                pl.BlockSpec((1, 2 * cout), lambda j, b: (0, 0)),
                pl.BlockSpec((1, 2 * cout), lambda j, b: (0, 0)),
            ],
            out_specs=pl.BlockSpec((1, U, 128), lambda j, b: (b, j, 0)),
        ),
        compiler_params=pltpu.CompilerParams(
            dimension_semantics=("parallel", "parallel"),
            vmem_limit_bytes=32 * 1024 * 1024),
        cost_estimate=pl.CostEstimate(flops=flops, transcendentals=0,
                                      bytes_accessed=bytes_accessed),
    )(xg, xg, wt_eo, shift2, alpha2)

    # (B, n_tiles*U, 128) row-major is bit-identical to (B, 2*n_tiles*U, 64); free reshape.
    return out2.reshape(B, 2 * n_tiles * U, cout)


def audio_cnn_frontend(x, w, gamma, beta, running_mean, running_var, alpha,
                       *, eps=1e-5, max_half_tile=4096, out_dtype=jnp.bfloat16):
    """frontend1D(x).transpose(1, 2) with inference-mode BatchNorm.

    Returns (out_padded, T_out): out_padded is (B, T_pad, 64) with T_pad >= T_out a
    multiple of the kernel time tile; rows >= T_out are padding for the downstream
    resnet trunk to mask/ignore (avoids a full-HBM copy for the tail slice)."""
    B, _, L = x.shape
    K = w.shape[-1]
    T_out = (L + 2 * PADDING - K) // STRIDE + 1
    out_padded = _frontend_padded(x, w, gamma, beta, running_mean, running_var, alpha,
                                  eps=eps, max_half_tile=max_half_tile,
                                  out_dtype=out_dtype)
    return out_padded, T_out


def audio_cnn_frontend_reference(x, w, gamma, beta, running_mean, running_var, alpha,
                                 *, eps=1e-5):
    """Pure-JAX reference (conv1d via explicit im2col), inference-mode BN, f32."""
    B, _, L = x.shape
    K = w.shape[-1]
    T_out = (L + 2 * PADDING - K) // STRIDE + 1
    xp = jnp.pad(x[:, 0, :], ((0, 0), (PADDING, PADDING)))
    idx = jnp.arange(T_out)[:, None] * STRIDE + jnp.arange(K)[None, :]
    patches = xp[:, idx]                                           # (B, T_out, K)
    y = jnp.einsum('btk,ck->btc', patches, w[:, 0, :],
                   precision=jax.lax.Precision.HIGHEST)
    scale = gamma / jnp.sqrt(running_var + eps)
    shift = beta - running_mean * scale
    y = y * scale + shift
    return jnp.where(y >= 0.0, y, alpha * y)


def make_params(key, *, cout=64, kernel_size=80):
    """Deterministic init mirroring AudioCNN._initialize_weights / module defaults."""
    n = kernel_size * cout
    w = jax.random.normal(key, (cout, 1, kernel_size), jnp.float32) * math.sqrt(2.0 / n)
    gamma = jnp.ones((cout,), jnp.float32)           # BN weight.fill_(1)
    beta = jnp.zeros((cout,), jnp.float32)           # BN bias.zero_()
    running_mean = jnp.zeros((cout,), jnp.float32)   # BN default running stats
    running_var = jnp.ones((cout,), jnp.float32)
    alpha = jnp.full((cout,), 0.25, jnp.float32)     # PReLU default init
    return w, gamma, beta, running_mean, running_var, alpha


if __name__ == "__main__":
    key = jax.random.PRNGKey(0)
    kx, kw, k2 = jax.random.split(key, 3)

    # ---- test 1: module-default params, single time tile ----
    B, L = 2, 256
    x = jax.random.normal(kx, (B, 1, L), jnp.float32)
    params = make_params(kw)
    out_pad, T_out = audio_cnn_frontend(x, *params)
    out_pad = jax.block_until_ready(out_pad)
    assert T_out == L // 4, T_out
    assert out_pad.shape[0] == B and out_pad.shape[2] == 64, out_pad.shape
    assert bool(jnp.all(jnp.isfinite(out_pad.astype(jnp.float32))))
    out = jnp.asarray(out_pad[:, :T_out, :], jnp.float32)
    ref = audio_cnn_frontend_reference(x, *params)
    err1 = float(jnp.max(jnp.abs(out - ref)))
    assert err1 < 5e-2, err1                         # bf16 operand/output tolerance

    # ---- test 2: multi-tile grid, T_out not a multiple of 2U, non-trivial BN/PReLU ----
    kx2, kg, kb, km, kv, ka = jax.random.split(k2, 6)
    B2, L2 = 1, 4000                                 # T_out = 1000; U=128 -> 4 time tiles
    x2 = jax.random.normal(kx2, (B2, 1, L2), jnp.float32)
    w2 = params[0]
    gamma2 = 1.0 + 0.1 * jax.random.normal(kg, (64,), jnp.float32)
    beta2 = 0.1 * jax.random.normal(kb, (64,), jnp.float32)
    mean2 = 0.1 * jax.random.normal(km, (64,), jnp.float32)
    var2 = 1.0 + 0.1 * jax.random.uniform(kv, (64,), jnp.float32)
    alpha2 = 0.5 * jax.random.uniform(ka, (64,), jnp.float32)
    p2 = (w2, gamma2, beta2, mean2, var2, alpha2)
    out2_pad, T2 = audio_cnn_frontend(x2, *p2, max_half_tile=128)
    out2_pad = jax.block_until_ready(out2_pad)
    assert T2 == 1000 and out2_pad.shape == (B2, 1024, 64), (T2, out2_pad.shape)
    out2 = jnp.asarray(out2_pad[:, :T2, :], jnp.float32)
    ref2 = audio_cnn_frontend_reference(x2, *p2)
    err2 = float(jnp.max(jnp.abs(out2 - ref2)))
    assert err2 < 5e-2, err2

    print("KERNEL_OK")
</pallas_src>

<mosaic_0001>
module attributes {stable_mosaic.version = 11 : i64} {
  func.func @_frontend_kernel(%arg0: i32, %arg1: i32, %arg2: memref<1x8x128xf32, #tpu.memory_space<vmem>>, %arg3: memref<1x8x128xf32, #tpu.memory_space<vmem>>, %arg4: memref<128x128xf32, #tpu.memory_space<vmem>>, %arg5: memref<1x128xf32, #tpu.memory_space<vmem>>, %arg6: memref<1x128xf32, #tpu.memory_space<vmem>>, %arg7: memref<1x128x128xbf16, #tpu.memory_space<vmem>>) attributes {dimension_semantics = [#tpu.dimension_semantics<parallel>, #tpu.dimension_semantics<parallel>], iteration_bounds = array<i64: 1, 2>, scalar_prefetch = 0 : i64, scratch_operands = 0 : i64, tpu.core_type = #tpu.core_type<tc>, window_params = [{transform_indices = @transform_0, window_bounds = array<i64: 1, 8, 128>}, {transform_indices = @transform_1, window_bounds = array<i64: 1, 8, 128>}, {pipeline_mode = #tpu.pipeline_mode<synchronous>, transform_indices = @transform_2, window_bounds = array<i64: 128, 128>}, {pipeline_mode = #tpu.pipeline_mode<synchronous>, transform_indices = @transform_3, window_bounds = array<i64: 1, 128>}, {pipeline_mode = #tpu.pipeline_mode<synchronous>, transform_indices = @transform_4, window_bounds = array<i64: 1, 128>}, {transform_indices = @transform_5, window_bounds = array<i64: 1, 128, 128>}]} {
    %c0 = arith.constant 0 : index
    %c0_0 = arith.constant 0 : index
    %c0_1 = arith.constant 0 : index
    %0 = vector.load %arg2[%c0, %c0_0, %c0_1] : memref<1x8x128xf32, #tpu.memory_space<vmem>>, vector<1x8x128xf32>
    %1 = vector.shape_cast %0 : vector<1x8x128xf32> to vector<8x128xf32>
    %c0_2 = arith.constant 0 : index
    %c0_3 = arith.constant 0 : index
    %c0_4 = arith.constant 0 : index
    %2 = vector.load %arg3[%c0_2, %c0_3, %c0_4] : memref<1x8x128xf32, #tpu.memory_space<vmem>>, vector<1x8x128xf32>
    %3 = vector.shape_cast %2 : vector<1x8x128xf32> to vector<8x128xf32>
    %4 = tpu.concatenate %1, %3 in 1 : vector<8x128xf32>, vector<8x128xf32> -> vector<8x256xf32>
    %5 = vector.extract_strided_slice %4 {offsets = [0, 0], sizes = [8, 128], strides = [1, 1]} : vector<8x256xf32> to vector<8x128xf32>
    %6 = vector.extract_strided_slice %4 {offsets = [0, 1], sizes = [8, 128], strides = [1, 1]} : vector<8x256xf32> to vector<8x128xf32>
    %7 = vector.extract_strided_slice %4 {offsets = [0, 2], sizes = [8, 128], strides = [1, 1]} : vector<8x256xf32> to vector<8x128xf32>
    %8 = vector.extract_strided_slice %4 {offsets = [0, 3], sizes = [8, 128], strides = [1, 1]} : vector<8x256xf32> to vector<8x128xf32>
    %9 = vector.extract_strided_slice %4 {offsets = [0, 4], sizes = [8, 128], strides = [1, 1]} : vector<8x256xf32> to vector<8x128xf32>
    %10 = vector.extract_strided_slice %4 {offsets = [0, 5], sizes = [8, 128], strides = [1, 1]} : vector<8x256xf32> to vector<8x128xf32>
    %11 = vector.extract_strided_slice %4 {offsets = [0, 6], sizes = [8, 128], strides = [1, 1]} : vector<8x256xf32> to vector<8x128xf32>
    %12 = vector.extract_strided_slice %4 {offsets = [0, 7], sizes = [8, 128], strides = [1, 1]} : vector<8x256xf32> to vector<8x128xf32>
    %13 = vector.extract_strided_slice %4 {offsets = [0, 8], sizes = [8, 128], strides = [1, 1]} : vector<8x256xf32> to vector<8x128xf32>
    %14 = vector.extract_strided_slice %4 {offsets = [0, 9], sizes = [8, 128], strides = [1, 1]} : vector<8x256xf32> to vector<8x128xf32>
    %15 = vector.extract_strided_slice %4 {offsets = [0, 10], sizes = [8, 128], strides = [1, 1]} : vector<8x256xf32> to vector<8x128xf32>
    %16 = vector.extract_strided_slice %4 {offsets = [0, 11], sizes = [8, 128], strides = [1, 1]} : vector<8x256xf32> to vector<8x128xf32>
    %17 = vector.extract_strided_slice %4 {offsets = [0, 12], sizes = [8, 128], strides = [1, 1]} : vector<8x256xf32> to vector<8x128xf32>
    %18 = vector.extract_strided_slice %4 {offsets = [0, 13], sizes = [8, 128], strides = [1, 1]} : vector<8x256xf32> to vector<8x128xf32>
    %19 = vector.extract_strided_slice %4 {offsets = [0, 14], sizes = [8, 128], strides = [1, 1]} : vector<8x256xf32> to vector<8x128xf32>
    %20 = vector.extract_strided_slice %4 {offsets = [0, 15], sizes = [8, 128], strides = [1, 1]} : vector<8x256xf32> to vector<8x128xf32>
    %21 = tpu.concatenate %5, %6, %7, %8, %9, %10, %11, %12, %13, %14, %15, %16, %17, %18, %19, %20 in 0 : vector<8x128xf32>, vector<8x128xf32>, vector<8x128xf32>, vector<8x128xf32>, vector<8x128xf32>, vector<8x128xf32>, vector<8x128xf32>, vector<8x128xf32>, vector<8x128xf32>, vector<8x128xf32>, vector<8x128xf32>, vector<8x128xf32>, vector<8x128xf32>, vector<8x128xf32>, vector<8x128xf32>, vector<8x128xf32> -> vector<128x128xf32>
    %22 = tpu.transpose %21, [1, 0] : vector<128x128xf32> -> vector<128x128xf32>
    %c0_5 = arith.constant 0 : index
    %c0_6 = arith.constant 0 : index
    %23 = vector.load %arg4[%c0_5, %c0_6] : memref<128x128xf32, #tpu.memory_space<vmem>>, vector<128x128xf32>
    %cst = arith.constant dense<0.000000e+00> : vector<128x128xf32>
    %24 = tpu.matmul %22, %23, %cst {dimension_numbers = #tpu.dot_dimension_numbers<[1], [0], [0], [1], [0, 0, 1, 1], [], []>} : vector<128x128xf32>, vector<128x128xf32>, vector<128x128xf32> -> vector<128x128xf32>
    %c0_7 = arith.constant 0 : index
    %c0_8 = arith.constant 0 : index
    %25 = vector.load %arg5[%c0_7, %c0_8] : memref<1x128xf32, #tpu.memory_space<vmem>>, vector<1x128xf32>
    %26 = vector.broadcast %25 : vector<1x128xf32> to vector<128x128xf32>
    %27 = arith.addf %24, %26 : vector<128x128xf32>
    %cst_9 = arith.constant 0.000000e+00 : f32
    %28 = vector.broadcast %cst_9 : f32 to vector<128x128xf32>
    %29 = arith.cmpf oge, %27, %28 : vector<128x128xf32>
    %c0_10 = arith.constant 0 : index
    %c0_11 = arith.constant 0 : index
    %30 = vector.load %arg6[%c0_10, %c0_11] : memref<1x128xf32, #tpu.memory_space<vmem>>, vector<1x128xf32>
    %31 = vector.broadcast %30 : vector<1x128xf32> to vector<128x128xf32>
    %32 = arith.mulf %31, %27 : vector<128x128xf32>
    %33 = arith.select %29, %27, %32 : vector<128x128xi1>, vector<128x128xf32>
    %34 = arith.truncf %33 : vector<128x128xf32> to vector<128x128xbf16>
    %c0_12 = arith.constant 0 : index
    %c0_13 = arith.constant 0 : index
    %c0_14 = arith.constant 0 : index
    %35 = vector.load %arg7[%c0_12, %c0_13, %c0_14] : memref<1x128x128xbf16, #tpu.memory_space<vmem>>, vector<1x128x128xbf16>
    %36 = vector.shape_cast %35 : vector<1x128x128xbf16> to vector<128x128xbf16>
    %37 = vector.shape_cast %34 : vector<128x128xbf16> to vector<1x128x128xbf16>
    tpu.vector_store %arg7[%c0_12, %c0_13, %c0_14], %37 {strides = array<i32>} : memref<1x128x128xbf16, #tpu.memory_space<vmem>>, vector<1x128x128xbf16>,
    return
  }
  func.func @transform_0(%arg0: i32, %arg1: i32) -> (i32, i32, i32) {
    %c0_i32 = arith.constant 0 : i32
    %c0_i32_0 = arith.constant 0 : i32
    return %arg1, %c0_i32, %arg0 : i32, i32, i32
  }
  func.func @transform_1(%arg0: i32, %arg1: i32) -> (i32, i32, i32) {
    %c1_i32 = arith.constant 1 : i32
    %0 = arith.muli %arg0, %c1_i32 : i32
    %c1_i32_0 = arith.constant 1 : i32
    %1 = arith.addi %0, %c1_i32_0 : i32
    %c0_i32 = arith.constant 0 : i32
    %c0_i32_1 = arith.constant 0 : i32
    return %arg1, %c0_i32, %1 : i32, i32, i32
  }
  func.func @transform_2(%arg0: i32, %arg1: i32) -> (i32, i32) {
    %c0_i32 = arith.constant 0 : i32
    %c0_i32_0 = arith.constant 0 : i32
    %c0_i32_1 = arith.constant 0 : i32
    return %c0_i32, %c0_i32_0 : i32, i32
  }
  func.func @transform_3(%arg0: i32, %arg1: i32) -> (i32, i32) {
    %c0_i32 = arith.constant 0 : i32
    %c0_i32_0 = arith.constant 0 : i32
    %c0_i32_1 = arith.constant 0 : i32
    return %c0_i32, %c0_i32_0 : i32, i32
  }
  func.func @transform_4(%arg0: i32, %arg1: i32) -> (i32, i32) {
    %c0_i32 = arith.constant 0 : i32
    %c0_i32_0 = arith.constant 0 : i32
    %c0_i32_1 = arith.constant 0 : i32
    return %c0_i32, %c0_i32_0 : i32, i32
  }
  func.func @transform_5(%arg0: i32, %arg1: i32) -> (i32, i32, i32) {
    %c0_i32 = arith.constant 0 : i32
    %c0_i32_0 = arith.constant 0 : i32
    return %arg1, %arg0, %c0_i32 : i32, i32, i32
  }
}

</mosaic_0001>

<bundles_post_ra>
// kernel: _frontend_padded.1
= control target key start
LH: loop header
LB: loop body
LE: loop exit
PB: predicated region body
PF: predicated region fallthrough
CT: control target
= control target key end

     0   :  { %s1248_s18 = smov 0   ;;  %s1250_s19 = smov 0   ;;  %s1392_s0 = inlined_call_operand.vmem [shape: f32[2,8,256], index: 0, kind: input, shape index: {}, may-alias: {0,1}]   ;;  %s1393_s1 = inlined_call_operand.vmem [shape: f32[2,8,256], index: 1, kind: input, shape index: {}, may-alias: {0,1}]   ;;  %s1394_s2 = inlined_call_operand.vmem [shape: f32[128,128], index: 2, kind: input, shape index: {}]   ;;  %s1395_s3 = inlined_call_operand.vmem [shape: f32[1,128], index: 3, kind: input, shape index: {}]   ;;  %s1396_s4 = inlined_call_operand.vmem [shape: f32[1,128], index: 4, kind: input, shape index: {}]   ;;  %s1397_s5 = inlined_call_operand.vmem [shape: bf16[2,128,128], index: 5, kind: output, shape index: {}]  }
   0x1   :  { %s1252_s20 = smov 0  }
   0x2 LB: > { %s24_s21 = sadd.s32 1, %s1197_s19  ;;  %p850_p0 = scmp.ge.s32.totalorder %s1201_s20, 1  ;;  %s1201_s20 = sphi %s1252_s20, %s15_s20   ;;  %s1197_s19 = sphi %s1250_s19, %s1399_s19   ;;  %s1193_s18 = sphi %s1248_s18, %s1398_s18  }
   0x3   : > { %p25_p1 = scmp.ge.s32.totalorder %s24_s21, 2  ;;  %p225_p2 = scmp.lt.s32.totalorder %s1201_s20, 3 }
   0x5   : > { %s1401_s21 = smov (%p25_p1, %s24_s21), 0  ;;  %p226_p3 = pnand %p850_p0, %p225_p2 }
   0x6   : > { %p269_p4 = scmp.lt.s32.totalorder (!%p226_p3), %s1193_s18, 1  ;;  %s1203_s30 = smov (!%p226_p3), 127  }
   0x7   : > { %229 = sbr.rel (%p226_p3) target bundleno = 521 (0x209), region = 40  ;;  %s1204_s6 = smov (!%p226_p3), 125  }
   0x8   : > { %s1205_s7 = smov (!%p226_p3), 126   ;;  %s1206_s8 = smov (!%p226_p3), 124  }
   0x9   : > { %s1207_s9 = smov (!%p226_p3), 123   ;;  %s1208_s10 = smov (!%p226_p3), 122  }
   0xa   : > { %s1209_s11 = smov (!%p226_p3), 121   ;;  %s1210_s12 = smov (!%p226_p3), 120  }
   0xb   : > { %s1211_s13 = smov (!%p226_p3), 119   ;;  %s1212_s14 = smov (!%p226_p3), 118  }
   0xc   : > { %s1403_s18 = smov (!%p269_p4, %s1193_s18), 1  ;;  %s1213_s15 = smov 117   ;;  %v453_v3 = vld [vmem:[%s1394_s2 + $0x78] sm:$0xff]  ;;  %v452_v4 = vld [vmem:[%s1394_s2 + $0x70] sm:$0xff]  ;;  %v451_v5 = vld [vmem:[%s1394_s2 + $0x68] sm:$0xff]  ;;  %vm305_vm0 = vcmask 1039360  }
   0xd   : > { %s877_s22 = sshll.u32 %s1403_s18, 4  ;;  %s1214_s16 = smov 116   ;;  %977 = vmatprep.subr.mxu0 %v453_v3  ;;  %1033 = vmatprep.subr.mxu1 %v453_v3  ;;  %v450_v6 = vld [vmem:[%s1394_s2 + $0x60] sm:$0xff]  ;;  %v449_v7 = vld [vmem:[%s1394_s2 + $0x58] sm:$0xff]  ;;  %v448_v8 = vld [vmem:[%s1394_s2 + $0x50] sm:$0xff]  ;;  %vm312_vm1 = vcmask 1031168  }
   0xe   : > { %s276_s25 = scalar_lea.vmem %s1392_s0, %s877_s22  ;;  %s879_s26 = sadd.s32 8, %s877_s22  ;;  %978 = vmatpush3.msra.mxu0 %v453_v3  ;;  %1049 = vmatpush3.msra.mxu1 %v453_v3  ;;  %v447_v9 = vld [vmem:[%s1394_s2 + $0x48] sm:$0xff]  ;;  %v446_v10 = vld [vmem:[%s1394_s2 + $0x40] sm:$0xff]  ;;  %v445_v11 = vld [vmem:[%s1394_s2 + $0x38] sm:$0xff]  ;;  %vm319_vm2 = vcmask 1022976   ;;  %vm326_vm3 = vcmask 1014784  }
   0xf   : > { %s285_s29 = scalar_lea.vmem %s1393_s1, %s879_s26  ;;  %v1275_v0 = vld [vmem:[%s276_s25] sm:$0xff]  ;;  %s1215_s17 = smov 115   ;;  %979 = vmatprep.subr.mxu0 %v452_v4  ;;  %1034 = vmatprep.subr.mxu1 %v452_v4  ;;  %v444_v12 = vld [vmem:[%s1394_s2 + $0x30] sm:$0xff]  ;;  %v443_v13 = vld [vmem:[%s1394_s2 + $0x28] sm:$0xff]  ;;  %vm333_vm4 = vcmask 1006592   ;;  %vm340_vm5 = vcmask 998400  }
  0x10   : > { %v298_v1 = vld [vmem:[%s285_s29] sm:$0xff]  ;;  %s1216_s22 = smov 114   ;;  %s1217_s23 = smov 113   ;;  %980 = vmatpush3.msra.mxu0 %v452_v4  ;;  %1050 = vmatpush3.msra.mxu1 %v452_v4  ;;  %v441_v15 = vld [vmem:[%s1394_s2 + $0x18] sm:$0xff]  ;;  %v440_v16 = vld [vmem:[%s1394_s2 + $0x10] sm:$0xff]  ;;  %vm347_vm6 = vcmask 990208  }
  0x11   : > { %v1104_v2 = vpack.i.bf16 %v298_v1, %v1275_v0  ;;  %981 = vmatprep.subr.mxu0 %v451_v5  ;;  %1035 = vmatprep.subr.mxu1 %v451_v5  ;;  %v442_v14 = vld [vmem:[%s1394_s2 + $0x20] sm:$0xff]  ;;  %v439_v17 = vld [vmem:[%s1394_s2 + $0x8] sm:$0xff]  ;;  %vm354_vm7 = vcmask 982016   ;;  %vm361_vm8 = vcmask 973824   ;;  %vm368_vm9 = vcmask 965632  }
  0x12   : > { %982 = vmatpush3.msra.mxu0 %v451_v5  ;;  %1051 = vmatpush3.msra.mxu1 %v451_v5  ;;  %v438_v18 = vld [vmem:[%s1394_s2] sm:$0xff]  ;;  %vm375_vm10 = vcmask 957440   ;;  %vm382_vm11 = vcmask 949248   ;;  %vm389_vm12 = vcmask 941056   ;;  %vm396_vm13 = vcmask 932864  }
  0x13   : > { %1105 = vrot.lane.b32.xlu0 %v1104_v2, %s1203_s30  ;;  %1115 = vrot.lane.b32.xlu1 %v1104_v2, %s1204_s6  ;;  %vm403_vm14 = vcmask 924672  }
  0x14   : > { %983 = vmatprep.subr.mxu0 %v450_v6  ;;  %1036 = vmatprep.subr.mxu1 %v450_v6 }
  0x15   : > { %984 = vmatpush3.msra.mxu0 %v450_v6  ;;  %1052 = vmatpush3.msra.mxu1 %v450_v6 }
  0x16   : > { %985 = vmatprep.subr.mxu0 %v449_v7  ;;  %1037 = vmatprep.subr.mxu1 %v449_v7 }
  0x17   : > { %1110 = vrot.lane.b32.xlu0 %v1104_v2, %s1205_s7  ;;  %1120 = vrot.lane.b32.xlu1 %v1104_v2, %s1206_s8 }
  0x18   : > { %986 = vmatpush3.msra.mxu0 %v449_v7  ;;  %1053 = vmatpush3.msra.mxu1 %v449_v7 }
  0x19   : > { %987 = vmatprep.subr.mxu0 %v448_v8  ;;  %1038 = vmatprep.subr.mxu1 %v448_v8 }
  0x1a   : > { %988 = vmatpush3.msra.mxu0 %v448_v8  ;;  %1054 = vmatpush3.msra.mxu1 %v448_v8 }
  0x1b   : > { %1125 = vrot.lane.b32.xlu0 %v1104_v2, %s1207_s9  ;;  %1130 = vrot.lane.b32.xlu1 %v1104_v2, %s1208_s10 }
  0x1c   : > { %989 = vmatprep.subr.mxu0 %v447_v9  ;;  %1039 = vmatprep.subr.mxu1 %v447_v9 }
  0x1d   : > { %990 = vmatpush3.msra.mxu0 %v447_v9  ;;  %1055 = vmatpush3.msra.mxu1 %v447_v9 }
  0x1e   : > { %991 = vmatprep.subr.mxu0 %v446_v10  ;;  %1040 = vmatprep.subr.mxu1 %v446_v10 }
  0x1f   : > { %1135 = vrot.lane.b32.xlu0 %v1104_v2, %s1209_s11  ;;  %1140 = vrot.lane.b32.xlu1 %v1104_v2, %s1210_s12 }
  0x20   : > { %992 = vmatpush3.msra.mxu0 %v446_v10  ;;  %1056 = vmatpush3.msra.mxu1 %v446_v10 }
  0x21   : > { %993 = vmatprep.subr.mxu0 %v445_v11  ;;  %1041 = vmatprep.subr.mxu1 %v445_v11 }
  0x22   : > { %994 = vmatpush3.msra.mxu0 %v445_v11  ;;  %1057 = vmatpush3.msra.mxu1 %v445_v11 }
  0x23   : > { %1145 = vrot.lane.b32.xlu0 %v1104_v2, %s1211_s13  ;;  %1150 = vrot.lane.b32.xlu1 %v1104_v2, %s1212_s14  ;;  %s880_s14 = sshll.u32 %s1403_s18, 6 }
  0x24   : > { %995 = vmatprep.subr.mxu0 %v444_v12  ;;  %1042 = vmatprep.subr.mxu1 %v444_v12 }
  0x25   : > { %996 = vmatpush3.msra.mxu0 %v444_v12  ;;  %1058 = vmatpush3.msra.mxu1 %v444_v12 }
  0x26   : > { %997 = vmatprep.subr.mxu0 %v443_v13  ;;  %1043 = vmatprep.subr.mxu1 %v443_v13 }
  0x27   : > { %1155 = vrot.lane.b32.xlu0 %v1104_v2, %s1213_s15  ;;  %1160 = vrot.lane.b32.xlu1 %v1104_v2, %s1214_s16 }
  0x28   : > { %998 = vmatpush3.msra.mxu0 %v443_v13  ;;  %1059 = vmatpush3.msra.mxu1 %v443_v13 }
  0x29   : > { %999 = vmatprep.subr.mxu0 %v442_v14  ;;  %1044 = vmatprep.subr.mxu1 %v442_v14 }
  0x2a   : > { %1000 = vmatpush3.msra.mxu0 %v442_v14  ;;  %1060 = vmatpush3.msra.mxu1 %v442_v14 }
  0x2b   : > { %1165 = vrot.lane.b32.xlu0 %v1104_v2, %s1215_s17  ;;  %1170 = vrot.lane.b32.xlu1 %v1104_v2, %s1216_s22  ;;  %s1345_s17 = scalar_lea.vmem %s1397_s5, %s880_s14 }
  0x2c   : > { %1001 = vmatprep.subr.mxu0 %v441_v15  ;;  %1045 = vmatprep.subr.mxu1 %v441_v15 }
  0x2d   : > { %1002 = vmatpush3.msra.mxu0 %v441_v15  ;;  %1061 = vmatpush3.msra.mxu1 %v441_v15 }
  0x2e   : > { %1003 = vmatprep.subr.mxu0 %v440_v16  ;;  %1046 = vmatprep.subr.mxu1 %v440_v16 }
  0x2f   : > { %1175 = vrot.lane.b32.xlu0 %v1104_v2, %s1217_s23  ;;  %1004 = vmatpush3.msra.mxu0 %v440_v16 }
  0x30   : > { %1062 = vmatpush3.msra.mxu1 %v440_v16  ;;  %1005 = vmatprep.subr.mxu0 %v439_v17 }
  0x31   : > { %1047 = vmatprep.subr.mxu1 %v439_v17  ;;  %1006 = vmatpush3.msra.mxu0 %v439_v17 }
  0x32   : > { %1063 = vmatpush3.msra.mxu1 %v439_v17  ;;  %1007 = vmatprep.subr.mxu0 %v438_v18 }
  0x33   : > { %1048 = vmatprep.subr.mxu1 %v438_v18  ;;  %1008 = vmatpush3.msra.mxu0 %v438_v18 }
  0x34   : > { %1064 = vmatpush3.msra.mxu1 %v438_v18 }
  0x54   : > { %406 = vxpose.xlu1.b32.start [1/16] %v1275_v0, 128 }
  0x85   : > { %v1106_v19 = vpop.permute.xlu0 %1105  ;;  %v1116_v20 = vpop.permute.xlu1 %1115 }
  0x86   : > { %v1108_v21 = vunpack.i.h.bf16 %v1106_v19  ;;  %v1107_v22 = vunpack.i.l.bf16 %v1106_v19  ;;  %v1118_v27 = vunpack.i.h.bf16 %v1116_v20  ;;  %v1117_v28 = vunpack.i.l.bf16 %v1116_v20 }
  0x88   : > { %v306_v23 = vsel %vm305_vm0, %v1107_v22, %v1108_v21  ;;  %v320_v33 = vsel %vm319_vm2, %v1117_v28, %v1118_v27 }
  0x89   : > { %v1111_v24 = vpop.permute.xlu0 %1110  ;;  %407 = vxpose.xlu1.b32.cont [2/16] %v306_v23, 128  ;;  %v1121_v29 = vpop.permute.xlu1 %1120 }
  0x8a   : > { %v1113_v25 = vunpack.i.h.bf16 %v1111_v24  ;;  %v1112_v26 = vunpack.i.l.bf16 %v1111_v24  ;;  %v1123_v31 = vunpack.i.h.bf16 %v1121_v29  ;;  %v1122_v32 = vunpack.i.l.bf16 %v1121_v29 }
  0x8c   : > { %v313_v30 = vsel %vm312_vm1, %v1112_v26, %v1113_v25  ;;  %v327_v37 = vsel %vm326_vm3, %v1122_v32, %v1123_v31  ;;  %v1330_v31 = vld [vmem:[%s1395_s3] ss:$0 sm:$0xff] }
  0x8d   : > { %408 = vxpose.xlu1.b32.cont [3/16] %v313_v30, 128  ;;  %v1126_v34 = vpop.permute.xlu0 %1125  ;;  %v1131_v38 = vpop.permute.xlu1 %1130 }
  0x8e   : > { %v1128_v35 = vunpack.i.h.bf16 %v1126_v34  ;;  %v1127_v36 = vunpack.i.l.bf16 %v1126_v34  ;;  %v1133_v39 = vunpack.i.h.bf16 %v1131_v38  ;;  %v1132_v40 = vunpack.i.l.bf16 %v1131_v38 }
  0x90   : > { %v334_v41 = vsel %vm333_vm4, %v1127_v36, %v1128_v35  ;;  %v341_v45 = vsel %vm340_vm5, %v1132_v40, %v1133_v39 }
  0x91   : > { %409 = vxpose.xlu1.b32.cont [4/16] %v320_v33, 128  ;;  %v1136_v42 = vpop.permute.xlu0 %1135  ;;  %v1141_v46 = vpop.permute.xlu1 %1140  ;;  %v1335_v33 = vld [vmem:[%s1396_s4] ss:$0 sm:$0xff] }
  0x92   : > { %v1138_v43 = vunpack.i.h.bf16 %v1136_v42  ;;  %v1137_v44 = vunpack.i.l.bf16 %v1136_v42  ;;  %v1143_v47 = vunpack.i.h.bf16 %v1141_v46  ;;  %v1142_v48 = vunpack.i.l.bf16 %v1141_v46 }
  0x94   : > { %v348_v49 = vsel %vm347_vm6, %v1137_v44, %v1138_v43  ;;  %v355_v53 = vsel %vm354_vm7, %v1142_v48, %v1143_v47 }
  0x95   : > { %410 = vxpose.xlu1.b32.cont [5/16] %v327_v37, 128  ;;  %v1146_v50 = vpop.permute.xlu0 %1145  ;;  %v1151_v54 = vpop.permute.xlu1 %1150 }
  0x96   : > { %v1148_v51 = vunpack.i.h.bf16 %v1146_v50  ;;  %v1147_v52 = vunpack.i.l.bf16 %v1146_v50  ;;  %v1153_v55 = vunpack.i.h.bf16 %v1151_v54  ;;  %v1152_v56 = vunpack.i.l.bf16 %v1151_v54 }
  0x98   : > { %v362_v57 = vsel %vm361_vm8, %v1147_v52, %v1148_v51  ;;  %v369_v61 = vsel %vm368_vm9, %v1152_v56, %v1153_v55 }
  0x99   : > { %411 = vxpose.xlu1.b32.cont [6/16] %v334_v41, 128  ;;  %v1156_v58 = vpop.permute.xlu0 %1155  ;;  %v1161_v62 = vpop.permute.xlu1 %1160 }
  0x9a   : > { %v1158_v59 = vunpack.i.h.bf16 %v1156_v58  ;;  %v1157_v60 = vunpack.i.l.bf16 %v1156_v58  ;;  %v1163_v63 = vunpack.i.h.bf16 %v1161_v62  ;;  %v1162_v0 = vunpack.i.l.bf16 %v1161_v62 }
  0x9c   : > { %v376_v1 = vsel %vm375_vm10, %v1157_v60, %v1158_v59  ;;  %v383_v5 = vsel %vm382_vm11, %v1162_v0, %v1163_v63 }
  0x9d   : > { %412 = vxpose.xlu1.b32.cont [7/16] %v341_v45, 128  ;;  %v1166_v2 = vpop.permute.xlu0 %1165  ;;  %v1171_v6 = vpop.permute.xlu1 %1170 }
  0x9e   : > { %v1168_v3 = vunpack.i.h.bf16 %v1166_v2  ;;  %v1167_v4 = vunpack.i.l.bf16 %v1166_v2  ;;  %v1173_v7 = vunpack.i.h.bf16 %v1171_v6  ;;  %v1172_v8 = vunpack.i.l.bf16 %v1171_v6 }
  0xa0   : > { %v390_v9 = vsel %vm389_vm12, %v1167_v4, %v1168_v3  ;;  %v397_v13 = vsel %vm396_vm13, %v1172_v8, %v1173_v7 }
  0xa1   : > { %413 = vxpose.xlu1.b32.cont [8/16] %v348_v49, 128  ;;  %v1176_v10 = vpop.permute.xlu0 %1175 }
  0xa2   : > { %v1178_v11 = vunpack.i.h.bf16 %v1176_v10  ;;  %v1177_v12 = vunpack.i.l.bf16 %v1176_v10 }
  0xa4   : > { %v404_v14 = vsel %vm403_vm14, %v1177_v12, %v1178_v11 }
  0xa5   : > { %414 = vxpose.xlu1.b32.cont [9/16] %v355_v53, 128 }
  0xa9   : > { %415 = vxpose.xlu1.b32.cont [10/16] %v362_v57, 128 }
  0xad   : > { %416 = vxpose.xlu1.b32.cont [11/16] %v369_v61, 128 }
  0xb1   : > { %417 = vxpose.xlu1.b32.cont [12/16] %v376_v1, 128 }
  0xb5   : > { %418 = vxpose.xlu1.b32.cont [13/16] %v383_v5, 128 }
  0xb9   : > { %419 = vxpose.xlu1.b32.cont [14/16] %v390_v9, 128 }
  0xbd   : > { %420 = vxpose.xlu1.b32.cont [15/16] %v397_v13, 128 }
  0xc1   : > { %421 = vxpose.xlu1.b32.end [16/16] %v404_v14, 128 }
 0x101   : > { %v422_v15 = vpop.trf.xlu1 }
 0x102   : > { %1009 = vmatprep.mubr.f32.mxu0 %v422_v15 }
 0x105   : > { %v423_v16 = vpop.trf.xlu1 }
 0x106   : > { %1010 = vmatmul.mubr.f32.vlgmr.msra.gmra.mxu0 %v423_v16 }
 0x109   : > { %v424_v17 = vpop.trf.xlu1 }
 0x10a   : > { %1012 = vmatprep.mubr.f32.mxu0 %v424_v17 }
 0x10d   : > { %v425_v18 = vpop.trf.xlu1 }
 0x10e   : > { %1013 = vmatmul.mubr.f32.gmra.mxu0 %v425_v18 }
 0x111   : > { %v426_v19 = vpop.trf.xlu1 }
 0x112   : > { %1015 = vmatprep.mubr.f32.mxu0 %v426_v19 }
 0x115   : > { %v427_v20 = vpop.trf.xlu1 }
 0x116   : > { %1016 = vmatmul.mubr.f32.gmra.mxu0 %v427_v20 }
 0x119   : > { %v428_v21 = vpop.trf.xlu1 }
 0x11a   : > { %1018 = vmatprep.mubr.f32.mxu0 %v428_v21 }
 0x11d   : > { %v429_v22 = vpop.trf.xlu1 }
 0x11e   : > { %1019 = vmatmul.mubr.f32.gmra.mxu0 %v429_v22 }
 0x121   : > { %v430_v23 = vpop.trf.xlu1 }
 0x122   : > { %1021 = vmatprep.mubr.f32.mxu1 %v430_v23 }
 0x125   : > { %v431_v24 = vpop.trf.xlu1 }
 0x126   : > { %1022 = vmatmul.mubr.f32.vlgmr.msra.gmra.mxu1 %v431_v24 }
 0x129   : > { %v432_v25 = vpop.trf.xlu1 }
 0x12a   : > { %1024 = vmatprep.mubr.f32.mxu1 %v432_v25 }
 0x12d   : > { %v433_v26 = vpop.trf.xlu1 }
 0x12e   : > { %1025 = vmatmul.mubr.f32.gmra.mxu1 %v433_v26 }
 0x131   : > { %v434_v27 = vpop.trf.xlu1 }
 0x132   : > { %1027 = vmatprep.mubr.f32.mxu1 %v434_v27 }
 0x135   : > { %v435_v28 = vpop.trf.xlu1 }
 0x136   : > { %1028 = vmatmul.mubr.f32.gmra.mxu1 %v435_v28 }
 0x139   : > { %v436_v29 = vpop.trf.xlu1 }
 0x13a   : > { %1030 = vmatprep.mubr.f32.mxu1 %v436_v29 }
 0x13d   : > { %v437_v30 = vpop.trf.xlu1 }
 0x13e   : > { %1031 = vmatmul.mubr.f32.gmra.mxu1 %v437_v30 }
 0x1c6   : > { %v1011_v32 = vpop.f32.mrf.mxu0 }
 0x1c7   : > { %v533_v34 = vadd.f32 %v1011_v32, %v1330_v31 }
 0x1c8   : > { %v527_v35 = vpop.f32.mrf.mxu0 }
 0x1c9   : > { %v630_v36 = vmul.f32 %v1335_v33, %v533_v34  ;;  %v528_v37 = vadd.f32 %v1330_v31, %v527_v35  ;;  %vm607_vm15 = vcmp.ge.f32.partialorder %v533_v34, 0.0 }
 0x1cb   : > { %vm606_vm0 = vcmp.ge.f32.partialorder %v528_v37, 0.0  ;;  %v629_v38 = vmul.f32 %v1335_v33, %v528_v37  ;;  %v646_v39 = vsel %vm607_vm15, %v533_v34, %v630_v36 }
 0x1cd   : > { %v645_v40 = vsel %vm606_vm0, %v528_v37, %v629_v38 }
 0x1ce   : > { %v900_v41 = vpack.c.bf16 %v646_v39, %v645_v40  ;;  %v1014_v42 = vpop.f32.mrf.mxu0 }
 0x1cf   : > { %v543_v43 = vadd.f32 %v1014_v42, %v1330_v31 }
 0x1d0   : > { %901 = vst [vmem:[%s1345_s17] sm:$0xff] %v900_v41   ;;  %v537_v44 = vpop.f32.mrf.mxu0 }
 0x1d1   : > { %v632_v45 = vmul.f32 %v1335_v33, %v543_v43  ;;  %v538_v46 = vadd.f32 %v1330_v31, %v537_v44  ;;  %vm609_vm1 = vcmp.ge.f32.partialorder %v543_v43, 0.0 }
 0x1d3   : > { %vm608_vm2 = vcmp.ge.f32.partialorder %v538_v46, 0.0  ;;  %v631_v47 = vmul.f32 %v1335_v33, %v538_v46  ;;  %v648_v48 = vsel %vm609_vm1, %v543_v43, %v632_v45 }
 0x1d5   : > { %v647_v49 = vsel %vm608_vm2, %v538_v46, %v631_v47 }
 0x1d6   : > { %v905_v50 = vpack.c.bf16 %v648_v48, %v647_v49  ;;  %v1017_v51 = vpop.f32.mrf.mxu0 }
 0x1d7   : > { %v553_v52 = vadd.f32 %v1017_v51, %v1330_v31 }
 0x1d8   : > { %938 = vst [vmem:[%s1345_s17 + $0x8] sm:$0xff] %v905_v50   ;;  %v547_v53 = vpop.f32.mrf.mxu0 }
 0x1d9   : > { %v634_v54 = vmul.f32 %v1335_v33, %v553_v52  ;;  %v548_v55 = vadd.f32 %v1330_v31, %v547_v53  ;;  %vm611_vm3 = vcmp.ge.f32.partialorder %v553_v52, 0.0 }
 0x1db   : > { %vm610_vm4 = vcmp.ge.f32.partialorder %v548_v55, 0.0  ;;  %v633_v56 = vmul.f32 %v1335_v33, %v548_v55  ;;  %v650_v57 = vsel %vm611_vm3, %v553_v52, %v634_v54 }
 0x1dd   : > { %v649_v58 = vsel %vm610_vm4, %v548_v55, %v633_v56 }
 0x1de   : > { %v910_v59 = vpack.c.bf16 %v650_v57, %v649_v58  ;;  %v1020_v60 = vpop.f32.mrf.mxu0 }
 0x1df   : > { %v563_v61 = vadd.f32 %v1020_v60, %v1330_v31 }
 0x1e0   : > { %939 = vst [vmem:[%s1345_s17 + $0x10] sm:$0xff] %v910_v59   ;;  %v557_v62 = vpop.f32.mrf.mxu0 }
 0x1e1   : > { %v636_v63 = vmul.f32 %v1335_v33, %v563_v61  ;;  %v558_v0 = vadd.f32 %v1330_v31, %v557_v62  ;;  %vm613_vm5 = vcmp.ge.f32.partialorder %v563_v61, 0.0 }
 0x1e3   : > { %vm612_vm6 = vcmp.ge.f32.partialorder %v558_v0, 0.0  ;;  %v635_v1 = vmul.f32 %v1335_v33, %v558_v0  ;;  %v652_v2 = vsel %vm613_vm5, %v563_v61, %v636_v63 }
 0x1e5   : > { %v651_v3 = vsel %vm612_vm6, %v558_v0, %v635_v1 }
 0x1e6   : > { %v915_v4 = vpack.c.bf16 %v652_v2, %v651_v3  ;;  %v1023_v5 = vpop.f32.mrf.mxu1 }
 0x1e7   : > { %v573_v6 = vadd.f32 %v1023_v5, %v1330_v31 }
 0x1e8   : > { %940 = vst [vmem:[%s1345_s17 + $0x18] sm:$0xff] %v915_v4   ;;  %v567_v7 = vpop.f32.mrf.mxu1 }
 0x1e9   : > { %v638_v8 = vmul.f32 %v1335_v33, %v573_v6  ;;  %v568_v9 = vadd.f32 %v1330_v31, %v567_v7  ;;  %vm615_vm7 = vcmp.ge.f32.partialorder %v573_v6, 0.0 }
 0x1eb   : > { %vm614_vm8 = vcmp.ge.f32.partialorder %v568_v9, 0.0  ;;  %v637_v10 = vmul.f32 %v1335_v33, %v568_v9  ;;  %v654_v11 = vsel %vm615_vm7, %v573_v6, %v638_v8 }
 0x1ed   : > { %v653_v12 = vsel %vm614_vm8, %v568_v9, %v637_v10 }
 0x1ee   : > { %v920_v13 = vpack.c.bf16 %v654_v11, %v653_v12  ;;  %v1026_v14 = vpop.f32.mrf.mxu1 }
 0x1ef   : > { %v583_v15 = vadd.f32 %v1026_v14, %v1330_v31 }
 0x1f0   : > { %941 = vst [vmem:[%s1345_s17 + $0x20] sm:$0xff] %v920_v13   ;;  %v577_v16 = vpop.f32.mrf.mxu1 }
 0x1f1   : > { %v640_v17 = vmul.f32 %v1335_v33, %v583_v15  ;;  %v578_v18 = vadd.f32 %v1330_v31, %v577_v16  ;;  %vm617_vm9 = vcmp.ge.f32.partialorder %v583_v15, 0.0 }
 0x1f3   : > { %vm616_vm10 = vcmp.ge.f32.partialorder %v578_v18, 0.0  ;;  %v639_v19 = vmul.f32 %v1335_v33, %v578_v18  ;;  %v656_v20 = vsel %vm617_vm9, %v583_v15, %v640_v17 }
 0x1f5   : > { %v655_v21 = vsel %vm616_vm10, %v578_v18, %v639_v19 }
 0x1f6   : > { %v925_v22 = vpack.c.bf16 %v656_v20, %v655_v21  ;;  %v1029_v23 = vpop.f32.mrf.mxu1 }
 0x1f7   : > { %v593_v24 = vadd.f32 %v1029_v23, %v1330_v31 }
 0x1f8   : > { %942 = vst [vmem:[%s1345_s17 + $0x28] sm:$0xff] %v925_v22   ;;  %v587_v25 = vpop.f32.mrf.mxu1 }
 0x1f9   : > { %v642_v26 = vmul.f32 %v1335_v33, %v593_v24  ;;  %v588_v27 = vadd.f32 %v1330_v31, %v587_v25  ;;  %vm619_vm11 = vcmp.ge.f32.partialorder %v593_v24, 0.0 }
 0x1fb   : > { %vm618_vm12 = vcmp.ge.f32.partialorder %v588_v27, 0.0  ;;  %v641_v28 = vmul.f32 %v1335_v33, %v588_v27  ;;  %v658_v29 = vsel %vm619_vm11, %v593_v24, %v642_v26 }
 0x1fd   : > { %v657_v30 = vsel %vm618_vm12, %v588_v27, %v641_v28 }
 0x1fe   : > { %v930_v32 = vpack.c.bf16 %v658_v29, %v657_v30  ;;  %v1032_v34 = vpop.f32.mrf.mxu1 }
 0x1ff   : > { %v603_v35 = vadd.f32 %v1032_v34, %v1330_v31 }
 0x200   : > { %943 = vst [vmem:[%s1345_s17 + $0x30] sm:$0xff] %v930_v32   ;;  %v597_v36 = vpop.f32.mrf.mxu1 }
 0x201   : > { %v644_v37 = vmul.f32 %v1335_v33, %v603_v35  ;;  %v598_v38 = vadd.f32 %v1330_v31, %v597_v36  ;;  %vm621_vm13 = vcmp.ge.f32.partialorder %v603_v35, 0.0 }
 0x203   : > { %vm620_vm14 = vcmp.ge.f32.partialorder %v598_v38, 0.0  ;;  %v643_v39 = vmul.f32 %v1335_v33, %v598_v38  ;;  %v660_v40 = vsel %vm621_vm13, %v603_v35, %v644_v37 }
 0x205   : > { %v659_v41 = vsel %vm620_vm14, %v598_v38, %v643_v39 }
 0x206   : > { %v935_v42 = vpack.c.bf16 %v660_v40, %v659_v41 }
 0x208   : > { %944 = vst [vmem:[%s1345_s17 + $0x38] sm:$0xff] %v935_v42  }
 0x209 PF: > { %s15_s20 = sadd.s32 1, %s1201_s20   ;;  %s1398_s18 = smov %s1197_s19 }
 0x20a   : > { %p12_p5 = scmp.ge.s32.totalorder %s15_s20, 4   ;;  %s1399_s19 = smov %s1401_s21 }
 0x20c   :  { %14 = sbr.rel (!%p12_p5) target bundleno = 2 (0x2), region = 73 }

</bundles_post_ra>
